<compile_context>
chip_gen: v5e
topology: v5e:2x2
jax: 0.10.0
libtpu: 0.0.40
codegen_flags: <defaults>
</compile_context>

<pallas_src>
import functools
import math

import jax
import jax.numpy as jnp
from jax.experimental import pallas as pl
from jax.experimental.pallas import tpu as pltpu


def make_positional_encoding(max_len, d_model):
    """Exactly mirrors PositionalEncoding.__init__ buffer construction."""
    position = jnp.arange(0, max_len, dtype=jnp.float32)[:, None]        # (L,1)
    div_term = jnp.exp(jnp.arange(0, d_model, 2, dtype=jnp.float32)
                       * (-math.log(10000.0) / d_model))                 # (D/2,)
    pe = jnp.zeros((max_len, d_model), dtype=jnp.float32)
    pe = pe.at[:, 0::2].set(jnp.sin(position * div_term))
    pe = pe.at[:, 1::2].set(jnp.cos(position * div_term))
    return pe                                                            # (L, D)


def _encoder_kernel_vmem_table(tok_ref, pe_ref, emb_ref, out_ref, *,
                               scale, seq_tile, batch):
    """Small-table fast path.

    tok_ref : (S_pad*B,) int32 in SMEM (scalar prefetch), row = s*B + b
    pe_ref  : (seq_tile, D) f32 VMEM block — positional encoding rows
    emb_ref : (V, D) f32 VMEM block — whole embedding table, resident
    out_ref : (seq_tile, B, D) f32 VMEM block
    """
    ti = pl.program_id(0)
    base = ti * (seq_tile * batch)

    for s in range(seq_tile):                         # static unroll
        pe_row = pe_ref[pl.ds(s, 1), :]               # (1, D), broadcast over B
        rows = []
        for b in range(batch):                        # static unroll
            tok = tok_ref[base + s * batch + b]       # SMEM scalar
            rows.append(emb_ref[pl.ds(tok, 1), :])    # (1, D) dynamic-slice gather
        blk = rows[0] if batch == 1 else jnp.concatenate(rows, axis=0)  # (B, D)
        # src = emb(src) * sqrt(ninp); x = x + pe[s]
        out_ref[s] = blk * scale + pe_row
        # TODO(synk): nn.Dropout(p=0.5) applied here in PyTorch training mode;
        # treated as identity (eval mode) to keep the forward deterministic.


def _encoder_kernel_hbm_table(tok_ref, pe_ref, emb_hbm, out_ref, slab, sems, *,
                              scale, seq_tile, batch):
    """Large-table path: HBM-resident table, deep-pipelined row-gather DMAs.

    tok_ref : (S_pad*B,) int32 in SMEM (scalar prefetch), row = s*B + b
    pe_ref  : (seq_tile, D) f32 VMEM block
    emb_hbm : (V, D) ref in HBM (pl.ANY) — DMA-gathered row by row
    out_ref : (seq_tile, B, D) f32 VMEM block
    slab    : (seq_tile*B, D) VMEM scratch — gathered rows for the whole tile
    sems    : (seq_tile*B,) DMA semaphores
    """
    ti = pl.program_id(0)
    base = ti * (seq_tile * batch)
    n_rows = seq_tile * batch

    # 1) Read all token ids and issue ALL row-gather DMAs for this tile up
    #    front (issue-before-wait; the whole tile's rows are in flight at
    #    once, hiding gather latency behind itself).  SMEM reads happen
    #    before any .wait().
    copies = []
    for r in range(n_rows):                           # static unroll
        tok = tok_ref[base + r]
        cp = pltpu.make_async_copy(emb_hbm.at[tok], slab.at[r], sems.at[r])
        cp.start()
        copies.append(cp)

    # 2) Wait / compute / store one sequence position at a time, using the
    #    same descriptors that were started (no `.at[0]` re-derivation).
    for s in range(seq_tile):                         # static unroll
        for b in range(batch):
            copies[s * batch + b].wait()
        blk = slab[pl.ds(s * batch, batch), :]        # (B, D)
        out_ref[s] = (blk * scale + pe_ref[pl.ds(s, 1), :]).astype(out_ref.dtype)
        # TODO(synk): dropout identity (eval mode), see fast-path kernel.


def encoder_forward(src, emb_table, pe, *, seq_tile=None, table_in_vmem=None,
                    vmem_table_budget_bytes=4 * 1024 * 1024,
                    vmem_limit_bytes=None):
    """src: (S, B) int32; emb_table: (V, D) f32; pe: (max_len, D) f32.

    Returns (S, B, D) float32, matching Encoder.forward in eval mode.
    """
    S, B = src.shape
    V, D = emb_table.shape

    if seq_tile is None:
        # Bigger tiles amortize per-grid-step overhead; keep modest for tiny S.
        seq_tile = 8 if S <= 256 else 32
    seq_tile = max(8, (seq_tile // 8) * 8)            # keep (8,128) friendly

    n_tiles = (S + seq_tile - 1) // seq_tile
    s_pad = n_tiles * seq_tile

    # Clamp out-of-range ids so the gather can never go out of bounds
    # (nn.Embedding would raise instead), and pad the sequence up to a tile
    # multiple with token 0; padded rows are sliced off below.
    tok = jnp.clip(src.astype(jnp.int32), 0, V - 1)
    if s_pad != S:
        tok = jnp.pad(tok, ((0, s_pad - S), (0, 0)))
    tok_flat = tok.reshape(-1)                        # 1D SMEM layout: s*B + b

    pe_sl = pe[:s_pad].astype(jnp.float32)
    emb_table = emb_table.astype(jnp.float32)
    scale = float(math.sqrt(D))

    if table_in_vmem is None:
        table_in_vmem = (V * D * 4) <= vmem_table_budget_bytes

    pe_spec = pl.BlockSpec((seq_tile, D), lambda i, tok: (i, 0))
    out_spec = pl.BlockSpec((seq_tile, B, D), lambda i, tok: (i, 0, 0))

    if table_in_vmem:
        kernel = functools.partial(_encoder_kernel_vmem_table,
                                   scale=scale, seq_tile=seq_tile, batch=B)
        emb_spec = pl.BlockSpec((V, D), lambda i, tok: (0, 0))   # resident
        scratch = []
    else:
        kernel = functools.partial(_encoder_kernel_hbm_table,
                                   scale=scale, seq_tile=seq_tile, batch=B)
        emb_spec = pl.BlockSpec(memory_space=pl.ANY)             # stays in HBM
        scratch = [pltpu.VMEM((seq_tile * B, D), jnp.float32),
                   pltpu.SemaphoreType.DMA((seq_tile * B,))]

    out = pl.pallas_call(
        kernel,
        out_shape=jax.ShapeDtypeStruct((s_pad, B, D), jnp.float32),
        grid_spec=pltpu.PrefetchScalarGridSpec(
            num_scalar_prefetch=1,                    # token ids -> SMEM
            grid=(n_tiles,),
            in_specs=[pe_spec, emb_spec],
            out_specs=out_spec,
            scratch_shapes=scratch,
        ),
        compiler_params=pltpu.CompilerParams(
            dimension_semantics=("parallel",),
            vmem_limit_bytes=vmem_limit_bytes),
    )(tok_flat, pe_sl, emb_table)

    return out[:S]


if __name__ == "__main__":
    # Small, module-consistent shapes (seq-first like the PyTorch tutorial).
    ntoken = 128   # vocab size
    ninp = 32      # d_model
    S, B = 12, 4   # S not a tile multiple -> exercises padding + 2 grid tiles

    key = jax.random.PRNGKey(0)
    k_emb, k_src = jax.random.split(key)

    # Encoder.init_weights(): uniform_(-0.1, 0.1)
    emb_table = jax.random.uniform(
        k_emb, (ntoken, ninp), dtype=jnp.float32, minval=-0.1, maxval=0.1)
    pe = make_positional_encoding(max_len=5000, d_model=ninp)

    src = jax.random.randint(k_src, (S, B), minval=0, maxval=ntoken,
                             dtype=jnp.int32)

    # Plain-JAX reference (eval mode).
    ref = emb_table[src] * math.sqrt(ninp) + pe[:S][:, None, :]

    # 1) Fast path: table resident in VMEM (auto-selected for this table size).
    out_fast = jax.block_until_ready(encoder_forward(src, emb_table, pe))
    assert out_fast.shape == (S, B, ninp)
    assert jnp.allclose(out_fast, ref, atol=1e-5), "VMEM-table path mismatch"

    # 2) Large-table path (HBM table + DMA row gather), forced here so it is
    #    validated at small shapes as well.
    out_hbm = jax.block_until_ready(
        encoder_forward(src, emb_table, pe, table_in_vmem=False))
    assert out_hbm.shape == (S, B, ninp)
    assert jnp.allclose(out_hbm, ref, atol=1e-5), "HBM-table path mismatch"

    print("KERNEL_OK")
</pallas_src>

<mosaic_0001>
module attributes {stable_mosaic.version = 11 : i64} {
  func.func @_encoder_kernel_vmem_table(%arg0: i32, %arg1: memref<64xi32, #tpu.memory_space<smem>>, %arg2: memref<8x32xf32, #tpu.memory_space<vmem>>, %arg3: memref<128x32xf32, #tpu.memory_space<vmem>>, %arg4: memref<8x4x32xf32, #tpu.memory_space<vmem>>) attributes {dimension_semantics = [#tpu.dimension_semantics<parallel>], iteration_bounds = array<i64: 2>, scalar_prefetch = 1 : i64, scratch_operands = 0 : i64, tpu.core_type = #tpu.core_type<tc>, window_params = [{transform_indices = @transform_0, window_bounds = array<i64: 8, 32>}, {pipeline_mode = #tpu.pipeline_mode<synchronous>, transform_indices = @transform_1, window_bounds = array<i64: 128, 32>}, {transform_indices = @transform_2, window_bounds = array<i64: 8, 4, 32>}]} {
    %c32_i32 = arith.constant 32 : i32
    %0 = arith.muli %arg0, %c32_i32 : i32
    %c0 = arith.constant 0 : index
    %c0_0 = arith.constant 0 : index
    %1 = vector.load %arg2[%c0, %c0_0] : memref<8x32xf32, #tpu.memory_space<vmem>>, vector<1x32xf32>
    %c0_i32 = arith.constant 0 : i32
    %2 = arith.addi %0, %c0_i32 : i32
    %c0_i32_1 = arith.constant 0 : i32
    %3 = arith.addi %2, %c0_i32_1 : i32
    %4 = arith.index_cast %3 : i32 to index
    %5 = memref.load %arg1[%4] : memref<64xi32, #tpu.memory_space<smem>>
    %6 = arith.index_cast %5 : i32 to index
    %c0_2 = arith.constant 0 : index
    %7 = vector.load %arg3[%6, %c0_2] : memref<128x32xf32, #tpu.memory_space<vmem>>, vector<1x32xf32>
    %c0_i32_3 = arith.constant 0 : i32
    %8 = arith.addi %0, %c0_i32_3 : i32
    %c1_i32 = arith.constant 1 : i32
    %9 = arith.addi %8, %c1_i32 : i32
    %10 = arith.index_cast %9 : i32 to index
    %11 = memref.load %arg1[%10] : memref<64xi32, #tpu.memory_space<smem>>
    %12 = arith.index_cast %11 : i32 to index
    %c0_4 = arith.constant 0 : index
    %13 = vector.load %arg3[%12, %c0_4] : memref<128x32xf32, #tpu.memory_space<vmem>>, vector<1x32xf32>
    %c0_i32_5 = arith.constant 0 : i32
    %14 = arith.addi %0, %c0_i32_5 : i32
    %c2_i32 = arith.constant 2 : i32
    %15 = arith.addi %14, %c2_i32 : i32
    %16 = arith.index_cast %15 : i32 to index
    %17 = memref.load %arg1[%16] : memref<64xi32, #tpu.memory_space<smem>>
    %18 = arith.index_cast %17 : i32 to index
    %c0_6 = arith.constant 0 : index
    %19 = vector.load %arg3[%18, %c0_6] : memref<128x32xf32, #tpu.memory_space<vmem>>, vector<1x32xf32>
    %c0_i32_7 = arith.constant 0 : i32
    %20 = arith.addi %0, %c0_i32_7 : i32
    %c3_i32 = arith.constant 3 : i32
    %21 = arith.addi %20, %c3_i32 : i32
    %22 = arith.index_cast %21 : i32 to index
    %23 = memref.load %arg1[%22] : memref<64xi32, #tpu.memory_space<smem>>
    %24 = arith.index_cast %23 : i32 to index
    %c0_8 = arith.constant 0 : index
    %25 = vector.load %arg3[%24, %c0_8] : memref<128x32xf32, #tpu.memory_space<vmem>>, vector<1x32xf32>
    %26 = tpu.concatenate %7, %13, %19, %25 in 0 : vector<1x32xf32>, vector<1x32xf32>, vector<1x32xf32>, vector<1x32xf32> -> vector<4x32xf32>
    %cst = arith.constant 5.65685415 : f32
    %27 = vector.broadcast %cst : f32 to vector<4x32xf32>
    %28 = arith.mulf %26, %27 : vector<4x32xf32>
    %29 = vector.broadcast %1 : vector<1x32xf32> to vector<4x32xf32>
    %30 = arith.addf %28, %29 : vector<4x32xf32>
    %c0_9 = arith.constant 0 : index
    %c0_10 = arith.constant 0 : index
    %c0_11 = arith.constant 0 : index
    %31 = vector.load %arg4[%c0_9, %c0_10, %c0_11] : memref<8x4x32xf32, #tpu.memory_space<vmem>>, vector<1x4x32xf32>
    %32 = vector.shape_cast %31 : vector<1x4x32xf32> to vector<4x32xf32>
    %33 = vector.shape_cast %30 : vector<4x32xf32> to vector<1x4x32xf32>
    tpu.vector_store %arg4[%c0_9, %c0_10, %c0_11], %33 {strides = array<i32>} : memref<8x4x32xf32, #tpu.memory_space<vmem>>, vector<1x4x32xf32>,
    %c1 = arith.constant 1 : index
    %c0_12 = arith.constant 0 : index
    %34 = vector.load %arg2[%c1, %c0_12] : memref<8x32xf32, #tpu.memory_space<vmem>>, vector<1x32xf32>
    %c4_i32 = arith.constant 4 : i32
    %35 = arith.addi %0, %c4_i32 : i32
    %c0_i32_13 = arith.constant 0 : i32
    %36 = arith.addi %35, %c0_i32_13 : i32
    %37 = arith.index_cast %36 : i32 to index
    %38 = memref.load %arg1[%37] : memref<64xi32, #tpu.memory_space<smem>>
    %39 = arith.index_cast %38 : i32 to index
    %c0_14 = arith.constant 0 : index
    %40 = vector.load %arg3[%39, %c0_14] : memref<128x32xf32, #tpu.memory_space<vmem>>, vector<1x32xf32>
    %c4_i32_15 = arith.constant 4 : i32
    %41 = arith.addi %0, %c4_i32_15 : i32
    %c1_i32_16 = arith.constant 1 : i32
    %42 = arith.addi %41, %c1_i32_16 : i32
    %43 = arith.index_cast %42 : i32 to index
    %44 = memref.load %arg1[%43] : memref<64xi32, #tpu.memory_space<smem>>
    %45 = arith.index_cast %44 : i32 to index
    %c0_17 = arith.constant 0 : index
    %46 = vector.load %arg3[%45, %c0_17] : memref<128x32xf32, #tpu.memory_space<vmem>>, vector<1x32xf32>
    %c4_i32_18 = arith.constant 4 : i32
    %47 = arith.addi %0, %c4_i32_18 : i32
    %c2_i32_19 = arith.constant 2 : i32
    %48 = arith.addi %47, %c2_i32_19 : i32
    %49 = arith.index_cast %48 : i32 to index
    %50 = memref.load %arg1[%49] : memref<64xi32, #tpu.memory_space<smem>>
    %51 = arith.index_cast %50 : i32 to index
    %c0_20 = arith.constant 0 : index
    %52 = vector.load %arg3[%51, %c0_20] : memref<128x32xf32, #tpu.memory_space<vmem>>, vector<1x32xf32>
    %c4_i32_21 = arith.constant 4 : i32
    %53 = arith.addi %0, %c4_i32_21 : i32
    %c3_i32_22 = arith.constant 3 : i32
    %54 = arith.addi %53, %c3_i32_22 : i32
    %55 = arith.index_cast %54 : i32 to index
    %56 = memref.load %arg1[%55] : memref<64xi32, #tpu.memory_space<smem>>
    %57 = arith.index_cast %56 : i32 to index
    %c0_23 = arith.constant 0 : index
    %58 = vector.load %arg3[%57, %c0_23] : memref<128x32xf32, #tpu.memory_space<vmem>>, vector<1x32xf32>
    %59 = tpu.concatenate %40, %46, %52, %58 in 0 : vector<1x32xf32>, vector<1x32xf32>, vector<1x32xf32>, vector<1x32xf32> -> vector<4x32xf32>
    %cst_24 = arith.constant 5.65685415 : f32
    %60 = vector.broadcast %cst_24 : f32 to vector<4x32xf32>
    %61 = arith.mulf %59, %60 : vector<4x32xf32>
    %62 = vector.broadcast %34 : vector<1x32xf32> to vector<4x32xf32>
    %63 = arith.addf %61, %62 : vector<4x32xf32>
    %c1_25 = arith.constant 1 : index
    %c0_26 = arith.constant 0 : index
    %c0_27 = arith.constant 0 : index
    %64 = vector.load %arg4[%c1_25, %c0_26, %c0_27] : memref<8x4x32xf32, #tpu.memory_space<vmem>>, vector<1x4x32xf32>
    %65 = vector.shape_cast %64 : vector<1x4x32xf32> to vector<4x32xf32>
    %66 = vector.shape_cast %63 : vector<4x32xf32> to vector<1x4x32xf32>
    tpu.vector_store %arg4[%c1_25, %c0_26, %c0_27], %66 {strides = array<i32>} : memref<8x4x32xf32, #tpu.memory_space<vmem>>, vector<1x4x32xf32>,
    %c2 = arith.constant 2 : index
    %c0_28 = arith.constant 0 : index
    %67 = vector.load %arg2[%c2, %c0_28] : memref<8x32xf32, #tpu.memory_space<vmem>>, vector<1x32xf32>
    %c8_i32 = arith.constant 8 : i32
    %68 = arith.addi %0, %c8_i32 : i32
    %c0_i32_29 = arith.constant 0 : i32
    %69 = arith.addi %68, %c0_i32_29 : i32
    %70 = arith.index_cast %69 : i32 to index
    %71 = memref.load %arg1[%70] : memref<64xi32, #tpu.memory_space<smem>>
    %72 = arith.index_cast %71 : i32 to index
    %c0_30 = arith.constant 0 : index
    %73 = vector.load %arg3[%72, %c0_30] : memref<128x32xf32, #tpu.memory_space<vmem>>, vector<1x32xf32>
    %c8_i32_31 = arith.constant 8 : i32
    %74 = arith.addi %0, %c8_i32_31 : i32
    %c1_i32_32 = arith.constant 1 : i32
    %75 = arith.addi %74, %c1_i32_32 : i32
    %76 = arith.index_cast %75 : i32 to index
    %77 = memref.load %arg1[%76] : memref<64xi32, #tpu.memory_space<smem>>
    %78 = arith.index_cast %77 : i32 to index
    %c0_33 = arith.constant 0 : index
    %79 = vector.load %arg3[%78, %c0_33] : memref<128x32xf32, #tpu.memory_space<vmem>>, vector<1x32xf32>
    %c8_i32_34 = arith.constant 8 : i32
    %80 = arith.addi %0, %c8_i32_34 : i32
    %c2_i32_35 = arith.constant 2 : i32
    %81 = arith.addi %80, %c2_i32_35 : i32
    %82 = arith.index_cast %81 : i32 to index
    %83 = memref.load %arg1[%82] : memref<64xi32, #tpu.memory_space<smem>>
    %84 = arith.index_cast %83 : i32 to index
    %c0_36 = arith.constant 0 : index
    %85 = vector.load %arg3[%84, %c0_36] : memref<128x32xf32, #tpu.memory_space<vmem>>, vector<1x32xf32>
    %c8_i32_37 = arith.constant 8 : i32
    %86 = arith.addi %0, %c8_i32_37 : i32
    %c3_i32_38 = arith.constant 3 : i32
    %87 = arith.addi %86, %c3_i32_38 : i32
    %88 = arith.index_cast %87 : i32 to index
    %89 = memref.load %arg1[%88] : memref<64xi32, #tpu.memory_space<smem>>
    %90 = arith.index_cast %89 : i32 to index
    %c0_39 = arith.constant 0 : index
    %91 = vector.load %arg3[%90, %c0_39] : memref<128x32xf32, #tpu.memory_space<vmem>>, vector<1x32xf32>
    %92 = tpu.concatenate %73, %79, %85, %91 in 0 : vector<1x32xf32>, vector<1x32xf32>, vector<1x32xf32>, vector<1x32xf32> -> vector<4x32xf32>
    %cst_40 = arith.constant 5.65685415 : f32
    %93 = vector.broadcast %cst_40 : f32 to vector<4x32xf32>
    %94 = arith.mulf %92, %93 : vector<4x32xf32>
    %95 = vector.broadcast %67 : vector<1x32xf32> to vector<4x32xf32>
    %96 = arith.addf %94, %95 : vector<4x32xf32>
    %c2_41 = arith.constant 2 : index
    %c0_42 = arith.constant 0 : index
    %c0_43 = arith.constant 0 : index
    %97 = vector.load %arg4[%c2_41, %c0_42, %c0_43] : memref<8x4x32xf32, #tpu.memory_space<vmem>>, vector<1x4x32xf32>
    %98 = vector.shape_cast %97 : vector<1x4x32xf32> to vector<4x32xf32>
    %99 = vector.shape_cast %96 : vector<4x32xf32> to vector<1x4x32xf32>
    tpu.vector_store %arg4[%c2_41, %c0_42, %c0_43], %99 {strides = array<i32>} : memref<8x4x32xf32, #tpu.memory_space<vmem>>, vector<1x4x32xf32>,
    %c3 = arith.constant 3 : index
    %c0_44 = arith.constant 0 : index
    %100 = vector.load %arg2[%c3, %c0_44] : memref<8x32xf32, #tpu.memory_space<vmem>>, vector<1x32xf32>
    %c12_i32 = arith.constant 12 : i32
    %101 = arith.addi %0, %c12_i32 : i32
    %c0_i32_45 = arith.constant 0 : i32
    %102 = arith.addi %101, %c0_i32_45 : i32
    %103 = arith.index_cast %102 : i32 to index
    %104 = memref.load %arg1[%103] : memref<64xi32, #tpu.memory_space<smem>>
    %105 = arith.index_cast %104 : i32 to index
    %c0_46 = arith.constant 0 : index
    %106 = vector.load %arg3[%105, %c0_46] : memref<128x32xf32, #tpu.memory_space<vmem>>, vector<1x32xf32>
    %c12_i32_47 = arith.constant 12 : i32
    %107 = arith.addi %0, %c12_i32_47 : i32
    %c1_i32_48 = arith.constant 1 : i32
    %108 = arith.addi %107, %c1_i32_48 : i32
    %109 = arith.index_cast %108 : i32 to index
    %110 = memref.load %arg1[%109] : memref<64xi32, #tpu.memory_space<smem>>
    %111 = arith.index_cast %110 : i32 to index
    %c0_49 = arith.constant 0 : index
    %112 = vector.load %arg3[%111, %c0_49] : memref<128x32xf32, #tpu.memory_space<vmem>>, vector<1x32xf32>
    %c12_i32_50 = arith.constant 12 : i32
    %113 = arith.addi %0, %c12_i32_50 : i32
    %c2_i32_51 = arith.constant 2 : i32
    %114 = arith.addi %113, %c2_i32_51 : i32
    %115 = arith.index_cast %114 : i32 to index
    %116 = memref.load %arg1[%115] : memref<64xi32, #tpu.memory_space<smem>>
    %117 = arith.index_cast %116 : i32 to index
    %c0_52 = arith.constant 0 : index
    %118 = vector.load %arg3[%117, %c0_52] : memref<128x32xf32, #tpu.memory_space<vmem>>, vector<1x32xf32>
    %c12_i32_53 = arith.constant 12 : i32
    %119 = arith.addi %0, %c12_i32_53 : i32
    %c3_i32_54 = arith.constant 3 : i32
    %120 = arith.addi %119, %c3_i32_54 : i32
    %121 = arith.index_cast %120 : i32 to index
    %122 = memref.load %arg1[%121] : memref<64xi32, #tpu.memory_space<smem>>
    %123 = arith.index_cast %122 : i32 to index
    %c0_55 = arith.constant 0 : index
    %124 = vector.load %arg3[%123, %c0_55] : memref<128x32xf32, #tpu.memory_space<vmem>>, vector<1x32xf32>
    %125 = tpu.concatenate %106, %112, %118, %124 in 0 : vector<1x32xf32>, vector<1x32xf32>, vector<1x32xf32>, vector<1x32xf32> -> vector<4x32xf32>
    %cst_56 = arith.constant 5.65685415 : f32
    %126 = vector.broadcast %cst_56 : f32 to vector<4x32xf32>
    %127 = arith.mulf %125, %126 : vector<4x32xf32>
    %128 = vector.broadcast %100 : vector<1x32xf32> to vector<4x32xf32>
    %129 = arith.addf %127, %128 : vector<4x32xf32>
    %c3_57 = arith.constant 3 : index
    %c0_58 = arith.constant 0 : index
    %c0_59 = arith.constant 0 : index
    %130 = vector.load %arg4[%c3_57, %c0_58, %c0_59] : memref<8x4x32xf32, #tpu.memory_space<vmem>>, vector<1x4x32xf32>
    %131 = vector.shape_cast %130 : vector<1x4x32xf32> to vector<4x32xf32>
    %132 = vector.shape_cast %129 : vector<4x32xf32> to vector<1x4x32xf32>
    tpu.vector_store %arg4[%c3_57, %c0_58, %c0_59], %132 {strides = array<i32>} : memref<8x4x32xf32, #tpu.memory_space<vmem>>, vector<1x4x32xf32>,
    %c4 = arith.constant 4 : index
    %c0_60 = arith.constant 0 : index
    %133 = vector.load %arg2[%c4, %c0_60] : memref<8x32xf32, #tpu.memory_space<vmem>>, vector<1x32xf32>
    %c16_i32 = arith.constant 16 : i32
    %134 = arith.addi %0, %c16_i32 : i32
    %c0_i32_61 = arith.constant 0 : i32
    %135 = arith.addi %134, %c0_i32_61 : i32
    %136 = arith.index_cast %135 : i32 to index
    %137 = memref.load %arg1[%136] : memref<64xi32, #tpu.memory_space<smem>>
    %138 = arith.index_cast %137 : i32 to index
    %c0_62 = arith.constant 0 : index
    %139 = vector.load %arg3[%138, %c0_62] : memref<128x32xf32, #tpu.memory_space<vmem>>, vector<1x32xf32>
    %c16_i32_63 = arith.constant 16 : i32
    %140 = arith.addi %0, %c16_i32_63 : i32
    %c1_i32_64 = arith.constant 1 : i32
    %141 = arith.addi %140, %c1_i32_64 : i32
    %142 = arith.index_cast %141 : i32 to index
    %143 = memref.load %arg1[%142] : memref<64xi32, #tpu.memory_space<smem>>
    %144 = arith.index_cast %143 : i32 to index
    %c0_65 = arith.constant 0 : index
    %145 = vector.load %arg3[%144, %c0_65] : memref<128x32xf32, #tpu.memory_space<vmem>>, vector<1x32xf32>
    %c16_i32_66 = arith.constant 16 : i32
    %146 = arith.addi %0, %c16_i32_66 : i32
    %c2_i32_67 = arith.constant 2 : i32
    %147 = arith.addi %146, %c2_i32_67 : i32
    %148 = arith.index_cast %147 : i32 to index
    %149 = memref.load %arg1[%148] : memref<64xi32, #tpu.memory_space<smem>>
    %150 = arith.index_cast %149 : i32 to index
    %c0_68 = arith.constant 0 : index
    %151 = vector.load %arg3[%150, %c0_68] : memref<128x32xf32, #tpu.memory_space<vmem>>, vector<1x32xf32>
    %c16_i32_69 = arith.constant 16 : i32
    %152 = arith.addi %0, %c16_i32_69 : i32
    %c3_i32_70 = arith.constant 3 : i32
    %153 = arith.addi %152, %c3_i32_70 : i32
    %154 = arith.index_cast %153 : i32 to index
    %155 = memref.load %arg1[%154] : memref<64xi32, #tpu.memory_space<smem>>
    %156 = arith.index_cast %155 : i32 to index
    %c0_71 = arith.constant 0 : index
    %157 = vector.load %arg3[%156, %c0_71] : memref<128x32xf32, #tpu.memory_space<vmem>>, vector<1x32xf32>
    %158 = tpu.concatenate %139, %145, %151, %157 in 0 : vector<1x32xf32>, vector<1x32xf32>, vector<1x32xf32>, vector<1x32xf32> -> vector<4x32xf32>
    %cst_72 = arith.constant 5.65685415 : f32
    %159 = vector.broadcast %cst_72 : f32 to vector<4x32xf32>
    %160 = arith.mulf %158, %159 : vector<4x32xf32>
    %161 = vector.broadcast %133 : vector<1x32xf32> to vector<4x32xf32>
    %162 = arith.addf %160, %161 : vector<4x32xf32>
    %c4_73 = arith.constant 4 : index
    %c0_74 = arith.constant 0 : index
    %c0_75 = arith.constant 0 : index
    %163 = vector.load %arg4[%c4_73, %c0_74, %c0_75] : memref<8x4x32xf32, #tpu.memory_space<vmem>>, vector<1x4x32xf32>
    %164 = vector.shape_cast %163 : vector<1x4x32xf32> to vector<4x32xf32>
    %165 = vector.shape_cast %162 : vector<4x32xf32> to vector<1x4x32xf32>
    tpu.vector_store %arg4[%c4_73, %c0_74, %c0_75], %165 {strides = array<i32>} : memref<8x4x32xf32, #tpu.memory_space<vmem>>, vector<1x4x32xf32>,
    %c5 = arith.constant 5 : index
    %c0_76 = arith.constant 0 : index
    %166 = vector.load %arg2[%c5, %c0_76] : memref<8x32xf32, #tpu.memory_space<vmem>>, vector<1x32xf32>
    %c20_i32 = arith.constant 20 : i32
    %167 = arith.addi %0, %c20_i32 : i32
    %c0_i32_77 = arith.constant 0 : i32
    %168 = arith.addi %167, %c0_i32_77 : i32
    %169 = arith.index_cast %168 : i32 to index
    %170 = memref.load %arg1[%169] : memref<64xi32, #tpu.memory_space<smem>>
    %171 = arith.index_cast %170 : i32 to index
    %c0_78 = arith.constant 0 : index
    %172 = vector.load %arg3[%171, %c0_78] : memref<128x32xf32, #tpu.memory_space<vmem>>, vector<1x32xf32>
    %c20_i32_79 = arith.constant 20 : i32
    %173 = arith.addi %0, %c20_i32_79 : i32
    %c1_i32_80 = arith.constant 1 : i32
    %174 = arith.addi %173, %c1_i32_80 : i32
    %175 = arith.index_cast %174 : i32 to index
    %176 = memref.load %arg1[%175] : memref<64xi32, #tpu.memory_space<smem>>
    %177 = arith.index_cast %176 : i32 to index
    %c0_81 = arith.constant 0 : index
    %178 = vector.load %arg3[%177, %c0_81] : memref<128x32xf32, #tpu.memory_space<vmem>>, vector<1x32xf32>
    %c20_i32_82 = arith.constant 20 : i32
    %179 = arith.addi %0, %c20_i32_82 : i32
    %c2_i32_83 = arith.constant 2 : i32
    %180 = arith.addi %179, %c2_i32_83 : i32
    %181 = arith.index_cast %180 : i32 to index
    %182 = memref.load %arg1[%181] : memref<64xi32, #tpu.memory_space<smem>>
    %183 = arith.index_cast %182 : i32 to index
    %c0_84 = arith.constant 0 : index
    %184 = vector.load %arg3[%183, %c0_84] : memref<128x32xf32, #tpu.memory_space<vmem>>, vector<1x32xf32>
    %c20_i32_85 = arith.constant 20 : i32
    %185 = arith.addi %0, %c20_i32_85 : i32
    %c3_i32_86 = arith.constant 3 : i32
    %186 = arith.addi %185, %c3_i32_86 : i32
    %187 = arith.index_cast %186 : i32 to index
    %188 = memref.load %arg1[%187] : memref<64xi32, #tpu.memory_space<smem>>
    %189 = arith.index_cast %188 : i32 to index
    %c0_87 = arith.constant 0 : index
    %190 = vector.load %arg3[%189, %c0_87] : memref<128x32xf32, #tpu.memory_space<vmem>>, vector<1x32xf32>
    %191 = tpu.concatenate %172, %178, %184, %190 in 0 : vector<1x32xf32>, vector<1x32xf32>, vector<1x32xf32>, vector<1x32xf32> -> vector<4x32xf32>
    %cst_88 = arith.constant 5.65685415 : f32
    %192 = vector.broadcast %cst_88 : f32 to vector<4x32xf32>
    %193 = arith.mulf %191, %192 : vector<4x32xf32>
    %194 = vector.broadcast %166 : vector<1x32xf32> to vector<4x32xf32>
    %195 = arith.addf %193, %194 : vector<4x32xf32>
    %c5_89 = arith.constant 5 : index
    %c0_90 = arith.constant 0 : index
    %c0_91 = arith.constant 0 : index
    %196 = vector.load %arg4[%c5_89, %c0_90, %c0_91] : memref<8x4x32xf32, #tpu.memory_space<vmem>>, vector<1x4x32xf32>
    %197 = vector.shape_cast %196 : vector<1x4x32xf32> to vector<4x32xf32>
    %198 = vector.shape_cast %195 : vector<4x32xf32> to vector<1x4x32xf32>
    tpu.vector_store %arg4[%c5_89, %c0_90, %c0_91], %198 {strides = array<i32>} : memref<8x4x32xf32, #tpu.memory_space<vmem>>, vector<1x4x32xf32>,
    %c6 = arith.constant 6 : index
    %c0_92 = arith.constant 0 : index
    %199 = vector.load %arg2[%c6, %c0_92] : memref<8x32xf32, #tpu.memory_space<vmem>>, vector<1x32xf32>
    %c24_i32 = arith.constant 24 : i32
    %200 = arith.addi %0, %c24_i32 : i32
    %c0_i32_93 = arith.constant 0 : i32
    %201 = arith.addi %200, %c0_i32_93 : i32
    %202 = arith.index_cast %201 : i32 to index
    %203 = memref.load %arg1[%202] : memref<64xi32, #tpu.memory_space<smem>>
    %204 = arith.index_cast %203 : i32 to index
    %c0_94 = arith.constant 0 : index
    %205 = vector.load %arg3[%204, %c0_94] : memref<128x32xf32, #tpu.memory_space<vmem>>, vector<1x32xf32>
    %c24_i32_95 = arith.constant 24 : i32
    %206 = arith.addi %0, %c24_i32_95 : i32
    %c1_i32_96 = arith.constant 1 : i32
    %207 = arith.addi %206, %c1_i32_96 : i32
    %208 = arith.index_cast %207 : i32 to index
    %209 = memref.load %arg1[%208] : memref<64xi32, #tpu.memory_space<smem>>
    %210 = arith.index_cast %209 : i32 to index
    %c0_97 = arith.constant 0 : index
    %211 = vector.load %arg3[%210, %c0_97] : memref<128x32xf32, #tpu.memory_space<vmem>>, vector<1x32xf32>
    %c24_i32_98 = arith.constant 24 : i32
    %212 = arith.addi %0, %c24_i32_98 : i32
    %c2_i32_99 = arith.constant 2 : i32
    %213 = arith.addi %212, %c2_i32_99 : i32
    %214 = arith.index_cast %213 : i32 to index
    %215 = memref.load %arg1[%214] : memref<64xi32, #tpu.memory_space<smem>>
    %216 = arith.index_cast %215 : i32 to index
    %c0_100 = arith.constant 0 : index
    %217 = vector.load %arg3[%216, %c0_100] : memref<128x32xf32, #tpu.memory_space<vmem>>, vector<1x32xf32>
    %c24_i32_101 = arith.constant 24 : i32
    %218 = arith.addi %0, %c24_i32_101 : i32
    %c3_i32_102 = arith.constant 3 : i32
    %219 = arith.addi %218, %c3_i32_102 : i32
    %220 = arith.index_cast %219 : i32 to index
    %221 = memref.load %arg1[%220] : memref<64xi32, #tpu.memory_space<smem>>
    %222 = arith.index_cast %221 : i32 to index
    %c0_103 = arith.constant 0 : index
    %223 = vector.load %arg3[%222, %c0_103] : memref<128x32xf32, #tpu.memory_space<vmem>>, vector<1x32xf32>
    %224 = tpu.concatenate %205, %211, %217, %223 in 0 : vector<1x32xf32>, vector<1x32xf32>, vector<1x32xf32>, vector<1x32xf32> -> vector<4x32xf32>
    %cst_104 = arith.constant 5.65685415 : f32
    %225 = vector.broadcast %cst_104 : f32 to vector<4x32xf32>
    %226 = arith.mulf %224, %225 : vector<4x32xf32>
    %227 = vector.broadcast %199 : vector<1x32xf32> to vector<4x32xf32>
    %228 = arith.addf %226, %227 : vector<4x32xf32>
    %c6_105 = arith.constant 6 : index
    %c0_106 = arith.constant 0 : index
    %c0_107 = arith.constant 0 : index
    %229 = vector.load %arg4[%c6_105, %c0_106, %c0_107] : memref<8x4x32xf32, #tpu.memory_space<vmem>>, vector<1x4x32xf32>
    %230 = vector.shape_cast %229 : vector<1x4x32xf32> to vector<4x32xf32>
    %231 = vector.shape_cast %228 : vector<4x32xf32> to vector<1x4x32xf32>
    tpu.vector_store %arg4[%c6_105, %c0_106, %c0_107], %231 {strides = array<i32>} : memref<8x4x32xf32, #tpu.memory_space<vmem>>, vector<1x4x32xf32>,
    %c7 = arith.constant 7 : index
    %c0_108 = arith.constant 0 : index
    %232 = vector.load %arg2[%c7, %c0_108] : memref<8x32xf32, #tpu.memory_space<vmem>>, vector<1x32xf32>
    %c28_i32 = arith.constant 28 : i32
    %233 = arith.addi %0, %c28_i32 : i32
    %c0_i32_109 = arith.constant 0 : i32
    %234 = arith.addi %233, %c0_i32_109 : i32
    %235 = arith.index_cast %234 : i32 to index
    %236 = memref.load %arg1[%235] : memref<64xi32, #tpu.memory_space<smem>>
    %237 = arith.index_cast %236 : i32 to index
    %c0_110 = arith.constant 0 : index
    %238 = vector.load %arg3[%237, %c0_110] : memref<128x32xf32, #tpu.memory_space<vmem>>, vector<1x32xf32>
    %c28_i32_111 = arith.constant 28 : i32
    %239 = arith.addi %0, %c28_i32_111 : i32
    %c1_i32_112 = arith.constant 1 : i32
    %240 = arith.addi %239, %c1_i32_112 : i32
    %241 = arith.index_cast %240 : i32 to index
    %242 = memref.load %arg1[%241] : memref<64xi32, #tpu.memory_space<smem>>
    %243 = arith.index_cast %242 : i32 to index
    %c0_113 = arith.constant 0 : index
    %244 = vector.load %arg3[%243, %c0_113] : memref<128x32xf32, #tpu.memory_space<vmem>>, vector<1x32xf32>
    %c28_i32_114 = arith.constant 28 : i32
    %245 = arith.addi %0, %c28_i32_114 : i32
    %c2_i32_115 = arith.constant 2 : i32
    %246 = arith.addi %245, %c2_i32_115 : i32
    %247 = arith.index_cast %246 : i32 to index
    %248 = memref.load %arg1[%247] : memref<64xi32, #tpu.memory_space<smem>>
    %249 = arith.index_cast %248 : i32 to index
    %c0_116 = arith.constant 0 : index
    %250 = vector.load %arg3[%249, %c0_116] : memref<128x32xf32, #tpu.memory_space<vmem>>, vector<1x32xf32>
    %c28_i32_117 = arith.constant 28 : i32
    %251 = arith.addi %0, %c28_i32_117 : i32
    %c3_i32_118 = arith.constant 3 : i32
    %252 = arith.addi %251, %c3_i32_118 : i32
    %253 = arith.index_cast %252 : i32 to index
    %254 = memref.load %arg1[%253] : memref<64xi32, #tpu.memory_space<smem>>
    %255 = arith.index_cast %254 : i32 to index
    %c0_119 = arith.constant 0 : index
    %256 = vector.load %arg3[%255, %c0_119] : memref<128x32xf32, #tpu.memory_space<vmem>>, vector<1x32xf32>
    %257 = tpu.concatenate %238, %244, %250, %256 in 0 : vector<1x32xf32>, vector<1x32xf32>, vector<1x32xf32>, vector<1x32xf32> -> vector<4x32xf32>
    %cst_120 = arith.constant 5.65685415 : f32
    %258 = vector.broadcast %cst_120 : f32 to vector<4x32xf32>
    %259 = arith.mulf %257, %258 : vector<4x32xf32>
    %260 = vector.broadcast %232 : vector<1x32xf32> to vector<4x32xf32>
    %261 = arith.addf %259, %260 : vector<4x32xf32>
    %c7_121 = arith.constant 7 : index
    %c0_122 = arith.constant 0 : index
    %c0_123 = arith.constant 0 : index
    %262 = vector.load %arg4[%c7_121, %c0_122, %c0_123] : memref<8x4x32xf32, #tpu.memory_space<vmem>>, vector<1x4x32xf32>
    %263 = vector.shape_cast %262 : vector<1x4x32xf32> to vector<4x32xf32>
    %264 = vector.shape_cast %261 : vector<4x32xf32> to vector<1x4x32xf32>
    tpu.vector_store %arg4[%c7_121, %c0_122, %c0_123], %264 {strides = array<i32>} : memref<8x4x32xf32, #tpu.memory_space<vmem>>, vector<1x4x32xf32>,
    return
  }
  func.func @transform_0(%arg0: i32, %arg1: memref<64xi32, #tpu.memory_space<smem>>) -> (i32, i32) {
    %c0_i32 = arith.constant 0 : i32
    %c0_i32_0 = arith.constant 0 : i32
    return %arg0, %c0_i32 : i32, i32
  }
  func.func @transform_1(%arg0: i32, %arg1: memref<64xi32, #tpu.memory_space<smem>>) -> (i32, i32) {
    %c0_i32 = arith.constant 0 : i32
    %c0_i32_0 = arith.constant 0 : i32
    %c0_i32_1 = arith.constant 0 : i32
    return %c0_i32, %c0_i32_0 : i32, i32
  }
  func.func @transform_2(%arg0: i32, %arg1: memref<64xi32, #tpu.memory_space<smem>>) -> (i32, i32, i32) {
    %c0_i32 = arith.constant 0 : i32
    %c0_i32_0 = arith.constant 0 : i32
    %c0_i32_1 = arith.constant 0 : i32
    return %arg0, %c0_i32, %c0_i32_0 : i32, i32, i32
  }
}

</mosaic_0001>

<bundles_post_ra>
// kernel: tpu_custom_call.1
= control target key start
LH: loop header
LB: loop body
LE: loop exit
PB: predicated region body
PF: predicated region fallthrough
CT: control target
= control target key end

     0   :  { %s682_s15 = smov [#allocation3]   ;;  %s1011_s0 = inlined_call_operand.vmem [shape: s32[64], index: 0, kind: input, shape index: {}]   ;;  %s1012_s1 = inlined_call_operand.vmem [shape: f32[16,32], index: 1, kind: input, shape index: {}]   ;;  %s1013_s2 = inlined_call_operand.vmem [shape: f32[128,32], index: 2, kind: input, shape index: {}]   ;;  %s1014_s3 = inlined_call_operand.hbm [shape: f32[16,4,32], index: 3, kind: output, shape index: {}]  }
   0x1   :  { %s9_s14 = sshll.u32 %s1011_s0, 4  ;;  %s10_s14 = int_to_ptr.vmem [resolvable:$true] %s9_s14 }
   0x2   :  { %12 = dma.vmem_to_smem %s10_s14, 16, %s682_s15, [#allocation2] }
   0x3   :  { %660 = dma.done.wait [#allocation2], 16 }
   0x4   :  { %661 = vsyncadd [#allocation2], 4294967280 }
   0x5   :  { %15 = sfence }
   0x6   :  { %16 = vsyncpa [#allocation5], 0 }
   0x7   :  { %18 = vsyncpa [#allocation5 + $0x1], 0  ;;  %s708_s16 = smov 0   ;;  %s710_s17 = smov 0  }
   0x8   :  { %s712_s18 = smov 0   ;;  %s714_s19 = smov 0  }
   0x9 LB: > { %s533_s0 = sadd.s32 4294967295, %s680_s19   ;;  %s534_s20 = sadd.s32 4294967294, %s680_s19   ;;  %s680_s19 = sphi %s714_s19, %s1022_s19   ;;  %s676_s18 = sphi %s712_s18, %s1021_s18   ;;  %s672_s17 = sphi %s710_s17, %s1020_s17   ;;  %s668_s16 = sphi %s708_s16, %s1019_s16  }
   0xa   : > { %s731_s21 = sadd.s32 1, %s680_s19   ;;  %s78_s22 = sadd.s32 1, %s676_s18 }
   0xb   : > { %s75_s23 = ssub.s32 %s680_s19, %s731_s21  ;;  %p88_p0 = scmp.ne.s32.totalorder %s676_s18, %s672_s17 }
   0xc   : > { %p76_p1 = scmp.eq.s32.totalorder %s75_s23, 0  ;;  %p89_p2 = scmp.eq.s32.totalorder %s533_s0, 1 }
   0xd   : > { %p94_p3 = scmp.ne.s32.totalorder %s672_s17, %s668_s16  ;;  %p95_p4 = scmp.eq.s32.totalorder %s534_s20, 1 }
   0xe   : > { %s741_s24 = scalar_select %p76_p1, %s676_s18, %s78_s22  }
   0xf   : > { %p743_p5 = por %p89_p2, %p88_p0  ;;  %p747_p6 = por %p95_p4, %p94_p3 }
  0x10   : > { %p537_p7 = scmp.ge.s32.totalorder %s680_s19, 1  ;;  %p123_p8 = scmp.lt.s32.totalorder %s680_s19, 3 }
  0x12   : > { %p124_p9 = pnand %p537_p7, %p123_p8 }
  0x13   : > { %p144_p10 = scmp.lt.s32.totalorder (!%p124_p9), %s533_s0, 1  ;;  %s753_s27 = sshll.u32 (!%p124_p9), %s533_s0, 5 }
  0x14   : > { %127 = sbr.rel (%p124_p9) target bundleno = 88 (0x58), region = 28  ;;  %s1015_s28 = sand.u32 (!%p124_p9), 1, %s672_s17  }
  0x15   : > { %s151_s29 = sld [smem:[#allocation3 + %s753_s27]] (!%p124_p9)  ;;  %s154_s30 = sadd.s32 (!%p124_p9), 1, %s753_s27 }
  0x16   : > { %s158_s4 = sadd.s32 (!%p124_p9), 2, %s753_s27  ;;  %s155_s6 = sld [smem:[#allocation3 + %s154_s30]] (!%p124_p9) }
  0x17   : > { %s159_s10 = sld [smem:[#allocation3 + %s158_s4]] (!%p124_p9)  ;;  %s766_s11 = sshll.u32 (!%p124_p9), %s1015_s28, 5 }
  0x18   : > { %s162_s12 = sadd.s32 (!%p124_p9), 3, %s753_s27  ;;  %s187_s22 = sadd.s32 (!%p124_p9), 4, %s753_s27 }
  0x19   : > { %s1024_s0 = smov (!%p144_p10, %s533_s0), 1  ;;  %s163_s13 = sld [smem:[#allocation3 + %s162_s12]]  ;;  %vm175_vm0 = vcmask 1040384   ;;  %vm177_vm1 = vcmask 1041408   ;;  %vm179_vm2 = vcmask 1042432   ;;  %vm184_vm3 = vcmask 257024  }
  0x1a   : > { %s539_s5 = sshll.u32 %s1024_s0, 3  ;;  %s773_s0 = sld [smem:[#allocation3 + %s187_s22]] }
  0x1b   : > { %s762_s9 = scalar_lea.vmem %s1012_s1, %s539_s5  ;;  %s152_s20 = scalar_lea.vmem %s1013_s2, %s151_s29 }
  0x1c   : > { %s156_s5 = scalar_lea.vmem %s1013_s2, %s155_s6  ;;  %s191_s4 = sadd.s32 5, %s753_s27  ;;  %v153_v0 = vld [vmem:[%s152_s20] sm:$0x1]  ;;  %v597_v22 = vld [vmem:[%s762_s9 + $0x1] ss:$0 sm:$0xff] }
  0x1d   : > { %v157_v1 = vld [vmem:[%s156_s5] sm:$0x1]  ;;  %s160_s12 = scalar_lea.vmem %s1013_s2, %s159_s10  ;;  %s192_s14 = sld [smem:[#allocation3 + %s191_s4]]  ;;  %v598_v35 = vld [vmem:[%s762_s9 + $0x2] ss:$0 sm:$0xff] }
  0x1e   : > { %v161_v2 = vld [vmem:[%s160_s12] sm:$0x1]  ;;  %v167_v3 = vrot.slane %v157_v1, 7  ;;  %s195_s29 = sadd.s32 6, %s753_s27  ;;  %s199_s6 = sadd.s32 7, %s753_s27 }
  0x1f   : > { %s164_s20 = scalar_lea.vmem %s1013_s2, %s163_s13  ;;  %v170_v4 = vrot.slane %v161_v2, 6  ;;  %s196_s23 = sld [smem:[#allocation3 + %s195_s29]]  ;;  %v596_v9 = vld [vmem:[%s762_s9] ss:$0 sm:$0xff]  ;;  %v599_v48 = vld [vmem:[%s762_s9 + $0x3] ss:$0 sm:$0xff] }
  0x20   : > { %v165_v5 = vld [vmem:[%s164_s20] sm:$0x1]  ;;  %v176_v6 = vsel %vm175_vm0, %v153_v0, %v167_v3  ;;  %s200_s10 = sld [smem:[#allocation3 + %s199_s6]]  ;;  %s221_s30 = sadd.s32 8, %s753_s27  ;;  %v600_v61 = vld [vmem:[%s762_s9 + $0x4] ss:$0 sm:$0xff] }
  0x21   : > { %v173_v7 = vrot.slane %v165_v5, 5  ;;  %v178_v8 = vsel %vm177_vm1, %v176_v6, %v170_v4  ;;  %s189_s7 = scalar_lea.vmem %s1013_s2, %s773_s0  ;;  %s794_s8 = sld [smem:[#allocation3 + %s221_s30]] }
  0x22   : > { %s225_s12 = sadd.s32 9, %s753_s27  ;;  %s229_s13 = sadd.s32 10, %s753_s27  ;;  %v190_v11 = vld [vmem:[%s189_s7] sm:$0x1] }
  0x23   : > { %v180_v10 = vsel %vm179_vm2, %v178_v8, %v173_v7  ;;  %s193_s15 = scalar_lea.vmem %s1013_s2, %s192_s14  ;;  %s226_s22 = sld [smem:[#allocation3 + %s225_s12]] }
  0x24   : > { %v181_v12 = vmul.f32 5.656854, %v180_v10  ;;  %v194_v13 = vld [vmem:[%s193_s15] sm:$0x1]  ;;  %s803_s20 = sld [smem:[#allocation3 + %s229_s13]]  ;;  %s233_s0 = sadd.s32 11, %s753_s27 }
  0x25   : > { %s197_s4 = scalar_lea.vmem %s1013_s2, %s196_s23  ;;  %v204_v14 = vrot.slane %v194_v13, 7  ;;  %s234_s7 = sld [smem:[#allocation3 + %s233_s0]]  ;;  %v601_v10 = vld [vmem:[%s762_s9 + $0x5] ss:$0 sm:$0xff] }
  0x26   : > { %v183_v15 = vadd.f32 %v596_v9, %v181_v12  ;;  %v198_v16 = vld [vmem:[%s197_s4] sm:$0x1]  ;;  %s201_s29 = scalar_lea.vmem %s1013_s2, %s200_s10  ;;  %s255_s6 = sadd.s32 12, %s753_s27 }
  0x27   : > { %v202_v17 = vld [vmem:[%s201_s29] sm:$0x1]  ;;  %v207_v18 = vrot.slane %v198_v16, 6  ;;  %v212_v19 = vsel %vm175_vm0, %v190_v11, %v204_v14  ;;  %s223_s23 = scalar_lea.vmem %s1013_s2, %s794_s8  ;;  %s818_s30 = sld [smem:[#allocation3 + %s255_s6]] }
  0x28   : > { %s821_s0 = scalar_lea.vmem [#allocation4], %s766_s11  ;;  %v210_v20 = vrot.slane %v202_v17, 5  ;;  %s259_s10 = sadd.s32 13, %s753_s27  ;;  %v224_v24 = vld [vmem:[%s223_s23] sm:$0x1] }
  0x29   : > { %185 = vst.msk [vmem:[%s821_s0] sm:$0xf] %vm184_vm3, %v183_v15  ;;  %v213_v21 = vsel %vm177_vm1, %v212_v19, %v207_v18  ;;  %s227_s14 = scalar_lea.vmem %s1013_s2, %s226_s22  ;;  %s831_s12 = sld [smem:[#allocation3 + %s259_s10]] }
  0x2a   : > { %v214_v23 = vsel %vm179_vm2, %v213_v21, %v210_v20  ;;  %v228_v25 = vld [vmem:[%s227_s14] sm:$0x1]  ;;  %s231_s29 = scalar_lea.vmem %s1013_s2, %s803_s20  ;;  %s263_s6 = sadd.s32 14, %s753_s27 }
  0x2b   : > { %v215_v26 = vmul.f32 5.656854, %v214_v23  ;;  %v232_v27 = vld [vmem:[%s231_s29] sm:$0x1]  ;;  %s235_s22 = scalar_lea.vmem %s1013_s2, %s234_s7  ;;  %v238_v28 = vrot.slane %v228_v25, 7  ;;  %s264_s10 = sld [smem:[#allocation3 + %s263_s6]] }
  0x2c   : > { %v236_v29 = vld [vmem:[%s235_s22] sm:$0x1]  ;;  %v241_v30 = vrot.slane %v232_v27, 6  ;;  %s267_s23 = sadd.s32 15, %s753_s27  ;;  %s289_s5 = sadd.s32 16, %s753_s27 }
  0x2d   : > { %v217_v31 = vadd.f32 %v597_v22, %v215_v26  ;;  %v244_v32 = vrot.slane %v236_v29, 5  ;;  %v246_v33 = vsel %vm175_vm0, %v224_v24, %v238_v28  ;;  %s257_s14 = scalar_lea.vmem %s1013_s2, %s818_s30  ;;  %s268_s11 = sld [smem:[#allocation3 + %s267_s23]]  ;;  %v602_v23 = vld [vmem:[%s762_s9 + $0x6] ss:$0 sm:$0xff] }
  0x2e   : > { %v247_v34 = vsel %vm177_vm1, %v246_v33, %v241_v30  ;;  %s851_s7 = sld [smem:[#allocation3 + %s289_s5]]  ;;  %s293_s8 = sadd.s32 17, %s753_s27  ;;  %v258_v37 = vld [vmem:[%s257_s14] sm:$0x1] }
  0x2f   : > { %541 = vst.msk [vmem:[%s821_s0 + $0x4] sm:$0xf] %vm184_vm3, %v217_v31  ;;  %v248_v36 = vsel %vm179_vm2, %v247_v34, %v244_v32  ;;  %s261_s13 = scalar_lea.vmem %s1013_s2, %s831_s12  ;;  %s294_s15 = sld [smem:[#allocation3 + %s293_s8]] }
  0x30   : > { %v249_v38 = vmul.f32 5.656854, %v248_v36  ;;  %v262_v39 = vld [vmem:[%s261_s13] sm:$0x1]  ;;  %s297_s30 = sadd.s32 18, %s753_s27  ;;  %s301_s22 = sadd.s32 19, %s753_s27 }
  0x31   : > { %s265_s20 = scalar_lea.vmem %s1013_s2, %s264_s10  ;;  %v272_v40 = vrot.slane %v262_v39, 7  ;;  %s298_s4 = sld [smem:[#allocation3 + %s297_s30]]  ;;  %v603_v36 = vld [vmem:[%s762_s9 + $0x7] ss:$0 sm:$0xff] }
  0x32   : > { %v251_v41 = vadd.f32 %v598_v35, %v249_v38  ;;  %v266_v42 = vld [vmem:[%s265_s20] sm:$0x1]  ;;  %s302_s14 = sld [smem:[#allocation3 + %s301_s22]]  ;;  %s323_s29 = sadd.s32 20, %s753_s27 }
  0x33   : > { %s269_s6 = scalar_lea.vmem %s1013_s2, %s268_s11  ;;  %v275_v43 = vrot.slane %v266_v42, 6  ;;  %v280_v44 = vsel %vm175_vm0, %v258_v37, %v272_v40  ;;  %s871_s13 = sld [smem:[#allocation3 + %s323_s29]] }
  0x34   : > { %542 = vst.msk [vmem:[%s821_s0 + $0x8] sm:$0xf] %vm184_vm3, %v251_v41  ;;  %v270_v45 = vld [vmem:[%s269_s6] sm:$0x1]  ;;  %s291_s23 = scalar_lea.vmem %s1013_s2, %s851_s7  ;;  %s327_s22 = sadd.s32 21, %s753_s27 }
  0x35   : > { %v278_v46 = vrot.slane %v270_v45, 5  ;;  %v281_v47 = vsel %vm177_vm1, %v280_v44, %v275_v43  ;;  %s295_s20 = scalar_lea.vmem %s1013_s2, %s294_s15  ;;  %s885_s12 = sld [smem:[#allocation3 + %s327_s22]]  ;;  %v292_v49 = vld [vmem:[%s291_s23] sm:$0x1] }
  0x36   : > { %v296_v50 = vld [vmem:[%s295_s20] sm:$0x1]  ;;  %s331_s29 = sadd.s32 22, %s753_s27  ;;  %s335_s8 = sadd.s32 23, %s753_s27 }
  0x37   : > { %v282_v51 = vsel %vm179_vm2, %v281_v47, %v278_v46  ;;  %s299_s10 = scalar_lea.vmem %s1013_s2, %s298_s4  ;;  %v306_v52 = vrot.slane %v296_v50, 7  ;;  %s332_s30 = sld [smem:[#allocation3 + %s331_s29]] }
  0x38   : > { %v283_v53 = vmul.f32 5.656854, %v282_v51  ;;  %v300_v54 = vld [vmem:[%s299_s10] sm:$0x1]  ;;  %s303_s23 = scalar_lea.vmem %s1013_s2, %s302_s14  ;;  %s336_s5 = sld [smem:[#allocation3 + %s335_s8]] }
  0x39   : > { %v304_v55 = vld [vmem:[%s303_s23] sm:$0x1]  ;;  %v309_v56 = vrot.slane %v300_v54, 6  ;;  %v314_v57 = vsel %vm175_vm0, %v292_v49, %v306_v52  ;;  %s325_s4 = scalar_lea.vmem %s1013_s2, %s871_s13  ;;  %s357_s29 = sadd.s32 24, %s753_s27 }
  0x3a   : > { %v285_v58 = vadd.f32 %v599_v48, %v283_v53  ;;  %v312_v59 = vrot.slane %v304_v55, 5  ;;  %s902_s7 = sld [smem:[#allocation3 + %s357_s29]]  ;;  %s361_s6 = sadd.s32 25, %s753_s27  ;;  %v326_v62 = vld [vmem:[%s325_s4] sm:$0x1] }
  0x3b   : > { %v315_v60 = vsel %vm177_vm1, %v314_v57, %v309_v56  ;;  %s329_s10 = scalar_lea.vmem %s1013_s2, %s885_s12  ;;  %s911_s15 = sld [smem:[#allocation3 + %s361_s6]] }
  0x3c   : > { %543 = vst.msk [vmem:[%s821_s0 + $0xc] sm:$0xf] %vm184_vm3, %v285_v58  ;;  %v316_v63 = vsel %vm179_vm2, %v315_v60, %v312_v59  ;;  %v330_v0 = vld [vmem:[%s329_s10] sm:$0x1]  ;;  %s365_s13 = sadd.s32 26, %s753_s27  ;;  %s369_s22 = sadd.s32 27, %s753_s27 }
  0x3d   : > { %v317_v1 = vmul.f32 5.656854, %v316_v63  ;;  %s333_s20 = scalar_lea.vmem %s1013_s2, %s332_s30  ;;  %v340_v2 = vrot.slane %v330_v0, 7  ;;  %s366_s12 = sld [smem:[#allocation3 + %s365_s13]] }
  0x3e   : > { %v334_v3 = vld [vmem:[%s333_s20] sm:$0x1]  ;;  %s337_s6 = scalar_lea.vmem %s1013_s2, %s336_s5  ;;  %s370_s14 = sld [smem:[#allocation3 + %s369_s22]] }
  0x3f   : > { %v319_v4 = vadd.f32 %v600_v61, %v317_v1  ;;  %v338_v5 = vld [vmem:[%s337_s6] sm:$0x1]  ;;  %v343_v6 = vrot.slane %v334_v3, 6  ;;  %v348_v7 = vsel %vm175_vm0, %v326_v62, %v340_v2  ;;  %s391_s8 = sadd.s32 28, %s753_s27  ;;  %s395_s10 = sadd.s32 29, %s753_s27 }
  0x40   : > { %v346_v8 = vrot.slane %v338_v5, 5  ;;  %s359_s13 = scalar_lea.vmem %s1013_s2, %s902_s7  ;;  %s931_s11 = sld [smem:[#allocation3 + %s391_s8]] }
  0x41   : > { %544 = vst.msk [vmem:[%s821_s0 + $0x10] sm:$0xf] %vm184_vm3, %v319_v4  ;;  %v349_v9 = vsel %vm177_vm1, %v348_v7, %v343_v6  ;;  %s363_s20 = scalar_lea.vmem %s1013_s2, %s911_s15  ;;  %s396_s4 = sld [smem:[#allocation3 + %s395_s10]]  ;;  %v360_v12 = vld [vmem:[%s359_s13] sm:$0x1] }
  0x42   : > { %v350_v11 = vsel %vm179_vm2, %v349_v9, %v346_v8  ;;  %v364_v13 = vld [vmem:[%s363_s20] sm:$0x1]  ;;  %s399_s29 = sadd.s32 30, %s753_s27  ;;  %s403_s7 = sadd.s32 31, %s753_s27 }
  0x43   : > { %v351_v14 = vmul.f32 5.656854, %v350_v11  ;;  %s367_s30 = scalar_lea.vmem %s1013_s2, %s366_s12  ;;  %v374_v15 = vrot.slane %v364_v13, 7  ;;  %s400_s23 = sld [smem:[#allocation3 + %s399_s29]] }
  0x44   : > { %v368_v16 = vld [vmem:[%s367_s30] sm:$0x1]  ;;  %s371_s10 = scalar_lea.vmem %s1013_s2, %s370_s14  ;;  %s404_s22 = sld [smem:[#allocation3 + %s403_s7]] }
  0x45   : > { %v353_v17 = vadd.f32 %v601_v10, %v351_v14  ;;  %v372_v18 = vld [vmem:[%s371_s10] sm:$0x1]  ;;  %v377_v19 = vrot.slane %v368_v16, 6  ;;  %v382_v20 = vsel %vm175_vm0, %v360_v12, %v374_v15  ;;  %s436_s15 = scalar_lea.hbm %s1014_s3, %s753_s27  ;;  %s437_s10 = sshll.u32 %s821_s0, 4  ;;  %s438_s10 = int_to_ptr.vmem [resolvable:$true] %s437_s10 }
  0x46   : > { %v380_v21 = vrot.slane %v372_v18, 5  ;;  %s393_s28 = scalar_lea.vmem %s1013_s2, %s931_s11  ;;  %s636_s29 = scalar_lea.hbm %s1014_s3, 64 }
  0x47   : > { %545 = vst.msk [vmem:[%s821_s0 + $0x14] sm:$0xf] %vm184_vm3, %v353_v17  ;;  %v383_v22 = vsel %vm177_vm1, %v382_v20, %v377_v19  ;;  %s397_s14 = scalar_lea.vmem %s1013_s2, %s396_s4  ;;  %v394_v25 = vld [vmem:[%s393_s28] sm:$0x1] }
  0x48   : > { %v384_v24 = vsel %vm179_vm2, %v383_v22, %v380_v21  ;;  %v398_v26 = vld [vmem:[%s397_s14] sm:$0x1] }
  0x49   : > { %v385_v27 = vmul.f32 5.656854, %v384_v24  ;;  %s401_s6 = scalar_lea.vmem %s1013_s2, %s400_s23  ;;  %v408_v28 = vrot.slane %v398_v26, 7  ;;  %s439_s23 = sshll.u32 %s436_s15, 4  ;;  %s440_s23 = int_to_ptr.hbm [resolvable:$true] %s439_s23 }
  0x4a   : > { %v402_v29 = vld [vmem:[%s401_s6] sm:$0x1]  ;;  %s405_s5 = scalar_lea.vmem %s1013_s2, %s404_s22  ;;  %s1018_s22 = sand.u32 1, %s672_s17  }
  0x4b   : > { %v387_v30 = vadd.f32 %v602_v23, %v385_v27  ;;  %v406_v31 = vld [vmem:[%s405_s5] sm:$0x1]  ;;  %v411_v32 = vrot.slane %v402_v29, 6  ;;  %v416_v33 = vsel %vm175_vm0, %v394_v25, %v408_v28  ;;  %s425_s13 = scalar_lea.sflag [#allocation5], %s1018_s22  ;;  %s630_s27 = sshra.s32 %s440_s23, 4  ;;  %s631_s27 = int_to_ptr.hbm [resolvable:$true] %s630_s27 }
  0x4c   : > { %v414_v34 = vrot.slane %v406_v31, 5  ;;  %s632_s20 = scalar_lea.hbm %s631_s27, 32  ;;  %p637_p0 = scmp.lt.s32.totalorder %s631_s27, %s1014_s3 }
  0x4d   : > { %546 = vst.msk [vmem:[%s821_s0 + $0x18] sm:$0xf] %vm184_vm3, %v387_v30  ;;  %v417_v35 = vsel %vm177_vm1, %v416_v33, %v411_v32  ;;  %p633_p11 = scmp.ne.s32.totalorder %s631_s27, %s632_s20  ;;  %p638_p1 = scmp.lt.s32.totalorder %s636_s29, %s632_s20 }
  0x4e   : > { %v418_v37 = vsel %vm179_vm2, %v417_v35, %v414_v34 }
  0x4f   : > { %v419_v38 = vmul.f32 5.656854, %v418_v37  ;;  %p634_p12 = pnand %p633_p11, %p743_p5  ;;  %p639_p2 = por %p638_p1, %p637_p0 }
  0x51   : > { %v421_v39 = vadd.f32 %v603_v36, %v419_v38  ;;  %p635_p13 = pneg %p634_p12 }
  0x53   : > { %547 = vst.msk [vmem:[%s821_s0 + $0x1c] sm:$0xf] %vm184_vm3, %v421_v39  ;;  %p640_p3 = pnand %p639_p2, %p635_p13 }
  0x55   : > { %643 = shalt.err (!%p640_p3)
}
  0x56   : > { %s683_s0 = smov 64   ;;  %s684_s11 = smov 4  }
  0x57   : > { %554 = dma.vmem_to_hbm [thread:$0]  (%p743_p5), %s438_s10, 512, %s440_s23, %s425_s13, %s683_s0, %s683_s0, %s684_s11  }
  0x58 PF: > { %p560_p4 = scmp.ge.s32.totalorder %s680_s19, 2  ;;  %s454_s6 = sand.u32 1, %s668_s16  }
  0x59   : > { %s455_s8 = scalar_lea.sflag [#allocation5], %s454_s6 }
  0x5a   : > { %p557_p7 = pnand %p560_p4, %p747_p6 }
  0x5c   : > { %p558_p8 = pneg %p557_p7 }
  0x5e   : > { %663 = dma.done.wait (%p558_p8), %s455_s8, 512  }
  0x5f   : > { %665 = vsyncadd (%p558_p8), %s455_s8, 4294966784  ;;  %p21_p9 = scmp.ge.s32.totalorder %s731_s21, 4   ;;  %s1019_s16 = smov %s672_s17 }
  0x60   : > { %s1020_s17 = smov %s676_s18  ;;  %s1021_s18 = smov %s741_s24 }
  0x61   : > { %s1022_s19 = smov %s731_s21  ;;  %23 = sbr.rel (!%p21_p9) target bundleno = 9 (0x9), region = 102 }
  0x66   :  { %461 = vsyncpa [#allocation5], 1 }
  0x67   :  { %463 = vsyncpa [#allocation5 + $0x1], 1 }

</bundles_post_ra>
